<compile_context>
chip_gen: v6e
topology: v6e:2x2x1
jax: 0.10.0
libtpu: 0.0.40
codegen_flags: <defaults>
</compile_context>

<pallas_src>
import functools
import math

import jax
import jax.numpy as jnp
from jax import lax
from jax.experimental import pallas as pl
from jax.experimental.pallas import tpu as pltpu


def _round_up(n, m):
    return ((n + m - 1) // m) * m


def _vmem_capacity_bytes():
    """Physical VMEM of the current TPU generation (conservative fallback)."""
    try:
        return int(pltpu.get_tpu_info().vmem_capacity_bytes)
    except Exception:
        return 64 * 1024 * 1024  # v7x-sized fallback: safe on every generation


def _choose_tiles(M, H, F, x_isz, w_isz, o_isz, vmem_budget):
    """Pick (tm, tf) under an explicit per-buffer VMEM byte budget.

    Preference order:
      1. Fully resident weights (tf == F) with a decent token tile -> weights
         are fetched from HBM exactly once per call.
      2. Otherwise the largest token tile (arithmetic intensity ~ tm) with the
         largest F chunk that still fits.
    """
    tm_cands = []
    for c in (1024, 768, 512, 384, 256, 128, 64, 32, 16, 8):
        t = min(c, M)
        if (t == M or t % 8 == 0) and t not in tm_cands:
            tm_cands.append(t)
    if not tm_cands:
        tm_cands = [M]

    tf_cands = [F]
    if F % 128 == 0:
        for c in (4096, 2048, 1024, 512, 256, 128):
            if c < F and F % c == 0:
                tf_cands.append(c)

    def footprint(tm, tf):
        return (2 * tm * H * x_isz                 # x tile (double-buffered)
                + 2 * tm * H * o_isz               # out tile (double-buffered)
                + tm * H * 4                       # f32 accumulator scratch
                + 2 * (H * tf + tf * H) * w_isz    # weight chunks (double-buffered)
                + 2 * (tf + H) * 4                 # bias chunks
                + tm * tf * 4)                     # f32 GELU intermediate

    for tm in tm_cands:                            # resident weights first
        if tm >= min(256, M) and footprint(tm, F) <= vmem_budget:
            return tm, F
    for tm in tm_cands:                            # else maximize tm, then tf
        for tf in tf_cands:
            if footprint(tm, tf) <= vmem_budget:
                return tm, tf
    return tm_cands[-1], tf_cands[-1]


def _ffn_kernel(x_ref, win_ref, bin_ref, wout_ref, bout_ref, o_ref, acc_ref,
                *, approximate_gelu):
    # x_ref: (tm, H)   win_ref: (H, tf)   bin_ref: (1, tf) f32
    # wout_ref: (tf, H)   bout_ref: (1, H) f32
    # o_ref: (tm, H)   acc_ref: (tm, H) f32 scratch
    j = pl.program_id(1)

    @pl.when(j == 0)
    def _():
        acc_ref[...] = jnp.zeros_like(acc_ref)

    # first linear: native-dtype MXU operands, f32 accumulation
    h = jnp.dot(x_ref[...], win_ref[...], preferred_element_type=jnp.float32)
    h = h + bin_ref[...]

    if approximate_gelu:
        # tanh form runs on the EUP slot (cheap) but deviates slightly from
        # torch.nn.GELU()'s default erf formulation.
        h = jax.nn.gelu(h, approximate=True)
    else:
        # exact erf GELU (matches torch.nn.GELU() default)
        inv_sqrt2 = jnp.float32(1.0 / math.sqrt(2.0))
        h = 0.5 * h * (1.0 + lax.erf(h * inv_sqrt2))

    # second linear: accumulate this F-chunk's contribution
    acc_ref[...] += jnp.dot(h.astype(wout_ref.dtype), wout_ref[...],
                            preferred_element_type=jnp.float32)

    @pl.when(j == pl.num_programs(1) - 1)
    def _():
        o_ref[...] = (acc_ref[...] + bout_ref[...]).astype(o_ref.dtype)


def prepare_params(w_in, b_in, w_out, b_out, compute_dtype=None):
    """Once-per-model weight preparation (hoisted out of the per-call path).

    Accepts PyTorch nn.Linear layout: w_in (F, H), b_in (F,), w_out (H, F),
    b_out (H,).  Returns kernel-layout params: (H,F)/(F,H) weights in the MXU
    compute dtype and f32 bias rows.
    """
    if compute_dtype is None:
        compute_dtype = jnp.asarray(w_in).dtype
    F, H = w_in.shape
    win_t = jnp.asarray(w_in).T.astype(compute_dtype)          # (H, F)
    wout_t = jnp.asarray(w_out).T.astype(compute_dtype)        # (F, H)
    bin_row = jnp.asarray(b_in).reshape(1, F).astype(jnp.float32)
    bout_row = jnp.asarray(b_out).reshape(1, H).astype(jnp.float32)
    return win_t, bin_row, wout_t, bout_row


def ffn_apply(x, params, *, gelu_approximate=False, interpret=False):
    """x: (..., H); params from prepare_params(). Returns same shape/dtype."""
    win_t, bin_row, wout_t, bout_row = params
    orig_shape = x.shape
    H = orig_shape[-1]
    F = win_t.shape[1]
    assert win_t.shape == (H, F) and wout_t.shape == (F, H)

    out_dtype = x.dtype
    compute_dtype = win_t.dtype
    x2 = x.reshape(-1, H).astype(compute_dtype)
    M = x2.shape[0]

    x_isz = jnp.dtype(compute_dtype).itemsize
    w_isz = jnp.dtype(compute_dtype).itemsize
    o_isz = jnp.dtype(out_dtype).itemsize

    vmem_phys = _vmem_capacity_bytes()
    vmem_budget = int(vmem_phys * 0.70)   # leave headroom for Mosaic scratch
    vmem_limit = int(min(vmem_phys * 0.85, vmem_phys - (4 << 20)))
    tm, tf = _choose_tiles(M, H, F, x_isz, w_isz, o_isz, vmem_budget)

    n_i = pl.cdiv(M, tm)
    grid = (n_i, F // tf)

    # Weights are re-streamed once per token tile unless tf == F (constant
    # block index -> fetched exactly once for the whole call).
    weight_passes = 1 if tf == F else n_i
    cost = pl.CostEstimate(
        flops=4 * M * H * F,                       # two matmuls
        transcendentals=M * F,                     # GELU
        bytes_accessed=(M * H * x_isz + M * H * o_isz
                        + weight_passes * 2 * H * F * w_isz
                        + (F + H) * 4),
    )

    kernel = functools.partial(_ffn_kernel, approximate_gelu=gelu_approximate)

    out = pl.pallas_call(
        kernel,
        out_shape=jax.ShapeDtypeStruct((M, H), out_dtype),
        grid_spec=pltpu.PrefetchScalarGridSpec(
            num_scalar_prefetch=0,
            grid=grid,
            in_specs=[
                pl.BlockSpec((tm, H), lambda i, j: (i, 0)),   # x tile
                pl.BlockSpec((H, tf), lambda i, j: (0, j)),   # W_in^T chunk
                pl.BlockSpec((1, tf), lambda i, j: (0, j)),   # b_in chunk
                pl.BlockSpec((tf, H), lambda i, j: (j, 0)),   # W_out^T chunk
                pl.BlockSpec((1, H), lambda i, j: (0, 0)),    # b_out
            ],
            out_specs=pl.BlockSpec((tm, H), lambda i, j: (i, 0)),
            scratch_shapes=[pltpu.VMEM((tm, H), jnp.float32)],
        ),
        compiler_params=pltpu.CompilerParams(
            dimension_semantics=("parallel", "arbitrary"),
            vmem_limit_bytes=vmem_limit,
        ),
        cost_estimate=cost,
        interpret=interpret,
    )(x2, win_t, bin_row, wout_t, bout_row)

    return out.reshape(orig_shape)


def position_wise_feed_forward(x, w_in, b_in, w_out, b_out, *,
                               compute_dtype=None, gelu_approximate=False):
    """One-shot convenience wrapper (PyTorch nn.Linear weight layout).
    For repeated calls, call prepare_params() once and reuse ffn_apply()."""
    params = prepare_params(w_in, b_in, w_out, b_out, compute_dtype)
    return ffn_apply(x, params, gelu_approximate=gelu_approximate)


def _torch_linear_init(key, out_features, in_features):
    """Deterministic init mimicking nn.Linear default (uniform +/- 1/sqrt(fan_in))."""
    kw, kb = jax.random.split(key)
    bound = 1.0 / math.sqrt(in_features)
    w = jax.random.uniform(kw, (out_features, in_features),
                           minval=-bound, maxval=bound, dtype=jnp.float32)
    b = jax.random.uniform(kb, (out_features,),
                           minval=-bound, maxval=bound, dtype=jnp.float32)
    return w, b


if __name__ == "__main__":
    # Toy shapes implied by the module (H=32, F=64 only use 32/64 of the 128
    # lanes; real models should keep H and F multiples of 128).
    num_hidden = 32
    num_ff = 64
    batch, seq = 2, 8   # 16 tokens total

    key = jax.random.PRNGKey(0)
    k_x, k_in, k_out = jax.random.split(key, 3)

    x = jax.random.normal(k_x, (batch, seq, num_hidden), dtype=jnp.float32)
    w_in, b_in = _torch_linear_init(k_in, num_ff, num_hidden)
    w_out, b_out = _torch_linear_init(k_out, num_hidden, num_ff)

    # Hoisted once-per-model weight preparation (transpose + cast).
    params = prepare_params(w_in, b_in, w_out, b_out)

    out = jax.block_until_ready(ffn_apply(x, params))

    # Pure-JAX reference (exact erf GELU, matching torch.nn.GELU default).
    h_ref = x @ w_in.T + b_in
    h_ref = 0.5 * h_ref * (1.0 + lax.erf(h_ref / jnp.sqrt(2.0)))
    ref = h_ref @ w_out.T + b_out

    assert out.shape == x.shape
    # Tolerance accommodates TPU MXU reduced-precision f32 matmul passes,
    # which may differ between the Pallas kernel and the XLA reference dot.
    max_err = float(jnp.max(jnp.abs(out - ref)))
    assert jnp.allclose(out, ref, atol=2e-2, rtol=2e-2), max_err

    print("KERNEL_OK")
</pallas_src>

<mosaic_0001>
module attributes {stable_mosaic.version = 11 : i64} {
  func.func @_ffn_kernel(%arg0: i32, %arg1: i32, %arg2: memref<16x32xf32, #tpu.memory_space<vmem>>, %arg3: memref<32x64xf32, #tpu.memory_space<vmem>>, %arg4: memref<1x64xf32, #tpu.memory_space<vmem>>, %arg5: memref<64x32xf32, #tpu.memory_space<vmem>>, %arg6: memref<1x32xf32, #tpu.memory_space<vmem>>, %arg7: memref<16x32xf32, #tpu.memory_space<vmem>>, %arg8: memref<16x32xf32, #tpu.memory_space<vmem>>) attributes {dimension_semantics = [#tpu.dimension_semantics<parallel>, #tpu.dimension_semantics<arbitrary>], iteration_bounds = array<i64: 1, 1>, scalar_prefetch = 0 : i64, scratch_operands = 1 : i64, tpu.core_type = #tpu.core_type<tc>, window_params = [{transform_indices = @transform_0, window_bounds = array<i64: 16, 32>}, {transform_indices = @transform_1, window_bounds = array<i64: 32, 64>}, {transform_indices = @transform_2, window_bounds = array<i64: 1, 64>}, {transform_indices = @transform_3, window_bounds = array<i64: 64, 32>}, {pipeline_mode = #tpu.pipeline_mode<synchronous>, transform_indices = @transform_4, window_bounds = array<i64: 1, 32>}, {transform_indices = @transform_5, window_bounds = array<i64: 16, 32>}]} {
    %c0_i32 = arith.constant 0 : i32
    %0 = arith.cmpi eq, %arg1, %c0_i32 : i32
    %1 = arith.extui %0 : i1 to i32
    %c0_i32_0 = arith.constant 0 : i32
    %2 = arith.cmpi ne, %1, %c0_i32_0 : i32
    scf.if %2 {
      %cst_18 = arith.constant 0.000000e+00 : f32
      %25 = vector.broadcast %cst_18 : f32 to vector<16x32xf32>
      %c0_19 = arith.constant 0 : index
      %c0_20 = arith.constant 0 : index
      %26 = vector.load %arg8[%c0_19, %c0_20] : memref<16x32xf32, #tpu.memory_space<vmem>>, vector<16x32xf32>
      tpu.vector_store %arg8[%c0_19, %c0_20], %25 {strides = array<i32>} : memref<16x32xf32, #tpu.memory_space<vmem>>, vector<16x32xf32>,
    } else {
    }
    %c0 = arith.constant 0 : index
    %c0_1 = arith.constant 0 : index
    %3 = vector.load %arg2[%c0, %c0_1] : memref<16x32xf32, #tpu.memory_space<vmem>>, vector<16x32xf32>
    %c0_2 = arith.constant 0 : index
    %c0_3 = arith.constant 0 : index
    %4 = vector.load %arg3[%c0_2, %c0_3] : memref<32x64xf32, #tpu.memory_space<vmem>>, vector<32x64xf32>
    %cst = arith.constant dense<0.000000e+00> : vector<16x64xf32>
    %5 = tpu.matmul %3, %4, %cst {dimension_numbers = #tpu.dot_dimension_numbers<[1], [0], [0], [1], [0, 0, 1, 1], [], []>} : vector<16x32xf32>, vector<32x64xf32>, vector<16x64xf32> -> vector<16x64xf32>
    %c0_4 = arith.constant 0 : index
    %c0_5 = arith.constant 0 : index
    %6 = vector.load %arg4[%c0_4, %c0_5] : memref<1x64xf32, #tpu.memory_space<vmem>>, vector<1x64xf32>
    %7 = vector.broadcast %6 : vector<1x64xf32> to vector<16x64xf32>
    %8 = arith.addf %5, %7 : vector<16x64xf32>
    %cst_6 = arith.constant 5.000000e-01 : f32
    %9 = vector.broadcast %cst_6 : f32 to vector<16x64xf32>
    %10 = arith.mulf %9, %8 : vector<16x64xf32>
    %cst_7 = arith.constant 0.707106769 : f32
    %11 = vector.broadcast %cst_7 : f32 to vector<16x64xf32>
    %12 = arith.mulf %8, %11 : vector<16x64xf32>
    %13 = math.erf %12 : vector<16x64xf32>
    %cst_8 = arith.constant 1.000000e+00 : f32
    %14 = vector.broadcast %cst_8 : f32 to vector<16x64xf32>
    %15 = arith.addf %14, %13 : vector<16x64xf32>
    %16 = arith.mulf %10, %15 : vector<16x64xf32>
    %c0_9 = arith.constant 0 : index
    %c0_10 = arith.constant 0 : index
    %17 = vector.load %arg8[%c0_9, %c0_10] : memref<16x32xf32, #tpu.memory_space<vmem>>, vector<16x32xf32>
    %c0_11 = arith.constant 0 : index
    %c0_12 = arith.constant 0 : index
    %18 = vector.load %arg5[%c0_11, %c0_12] : memref<64x32xf32, #tpu.memory_space<vmem>>, vector<64x32xf32>
    %cst_13 = arith.constant dense<0.000000e+00> : vector<16x32xf32>
    %19 = tpu.matmul %16, %18, %cst_13 {dimension_numbers = #tpu.dot_dimension_numbers<[1], [0], [0], [1], [0, 0, 1, 1], [], []>} : vector<16x64xf32>, vector<64x32xf32>, vector<16x32xf32> -> vector<16x32xf32>
    %20 = arith.addf %17, %19 : vector<16x32xf32>
    %c0_14 = arith.constant 0 : index
    %c0_15 = arith.constant 0 : index
    %21 = vector.load %arg8[%c0_14, %c0_15] : memref<16x32xf32, #tpu.memory_space<vmem>>, vector<16x32xf32>
    tpu.vector_store %arg8[%c0_14, %c0_15], %20 {strides = array<i32>} : memref<16x32xf32, #tpu.memory_space<vmem>>, vector<16x32xf32>,
    %c0_i32_16 = arith.constant 0 : i32
    %22 = arith.cmpi eq, %arg1, %c0_i32_16 : i32
    %23 = arith.extui %22 : i1 to i32
    %c0_i32_17 = arith.constant 0 : i32
    %24 = arith.cmpi ne, %23, %c0_i32_17 : i32
    scf.if %24 {
      %c0_18 = arith.constant 0 : index
      %c0_19 = arith.constant 0 : index
      %25 = vector.load %arg8[%c0_18, %c0_19] : memref<16x32xf32, #tpu.memory_space<vmem>>, vector<16x32xf32>
      %c0_20 = arith.constant 0 : index
      %c0_21 = arith.constant 0 : index
      %26 = vector.load %arg6[%c0_20, %c0_21] : memref<1x32xf32, #tpu.memory_space<vmem>>, vector<1x32xf32>
      %27 = vector.broadcast %26 : vector<1x32xf32> to vector<16x32xf32>
      %28 = arith.addf %25, %27 : vector<16x32xf32>
      %c0_22 = arith.constant 0 : index
      %c0_23 = arith.constant 0 : index
      %29 = vector.load %arg7[%c0_22, %c0_23] : memref<16x32xf32, #tpu.memory_space<vmem>>, vector<16x32xf32>
      tpu.vector_store %arg7[%c0_22, %c0_23], %28 {strides = array<i32>} : memref<16x32xf32, #tpu.memory_space<vmem>>, vector<16x32xf32>,
    } else {
    }
    return
  }
  func.func @transform_0(%arg0: i32, %arg1: i32) -> (i32, i32) {
    %c0_i32 = arith.constant 0 : i32
    %c0_i32_0 = arith.constant 0 : i32
    return %arg0, %c0_i32 : i32, i32
  }
  func.func @transform_1(%arg0: i32, %arg1: i32) -> (i32, i32) {
    %c0_i32 = arith.constant 0 : i32
    %c0_i32_0 = arith.constant 0 : i32
    return %c0_i32, %arg1 : i32, i32
  }
  func.func @transform_2(%arg0: i32, %arg1: i32) -> (i32, i32) {
    %c0_i32 = arith.constant 0 : i32
    %c0_i32_0 = arith.constant 0 : i32
    return %c0_i32, %arg1 : i32, i32
  }
  func.func @transform_3(%arg0: i32, %arg1: i32) -> (i32, i32) {
    %c0_i32 = arith.constant 0 : i32
    %c0_i32_0 = arith.constant 0 : i32
    return %arg1, %c0_i32 : i32, i32
  }
  func.func @transform_4(%arg0: i32, %arg1: i32) -> (i32, i32) {
    %c0_i32 = arith.constant 0 : i32
    %c0_i32_0 = arith.constant 0 : i32
    %c0_i32_1 = arith.constant 0 : i32
    return %c0_i32, %c0_i32_0 : i32, i32
  }
  func.func @transform_5(%arg0: i32, %arg1: i32) -> (i32, i32) {
    %c0_i32 = arith.constant 0 : i32
    %c0_i32_0 = arith.constant 0 : i32
    return %arg0, %c0_i32 : i32, i32
  }
}

</mosaic_0001>

<bundles_post_ra>
// kernel: tpu_custom_call.1
= control target key start
LH: loop header
LB: loop body
LE: loop exit
PB: predicated region body
PF: predicated region fallthrough
CT: control target
= control target key end

     0   :  { %vm25_vm0 = vcmask 261120   ;;  %s436_s0 = inlined_call_operand.vmem [shape: f32[16,32], index: 0, kind: input, shape index: {}]   ;;  %s437_s1 = inlined_call_operand.vmem [shape: f32[32,64], index: 1, kind: input, shape index: {}]   ;;  %s438_s2 = inlined_call_operand.vmem [shape: f32[1,64], index: 2, kind: input, shape index: {}]   ;;  %s439_s3 = inlined_call_operand.vmem [shape: f32[64,32], index: 3, kind: input, shape index: {}]   ;;  %s440_s4 = inlined_call_operand.vmem [shape: f32[1,32], index: 4, kind: input, shape index: {}]   ;;  %s441_s5 = inlined_call_operand.hbm [shape: f32[16,32], index: 5, kind: output, shape index: {}]  }
   0x1   :  { %v33_v0 = vld [vmem:[%s437_s1 + $0x18] sm:$0xff]  ;;  %v32_v1 = vld [vmem:[%s437_s1 + $0x10] sm:$0xff]  ;;  %v28_v2 = vld [vmem:[%s436_s0] sm:$0xff] }
   0x2   :  { %283 = vmatprep.subr.mxu0 %v33_v0  ;;  %v31_v3 = vld [vmem:[%s437_s1 + $0x8] sm:$0xff]  ;;  %291 = vmatprep.mubr.msk.f32.mxu0 %vm25_vm0, %v28_v2 }
   0x3   :  { %284 = vmatpush3.msra.mxu0 %v33_v0 }
   0x4   :  { %10 = vsyncpa [#allocation4], 0  ;;  %285 = vmatprep.subr.mxu0 %v32_v1  ;;  %v30_v4 = vld [vmem:[%s437_s1] sm:$0xff]  ;;  %v29_v5 = vld [vmem:[%s436_s0 + $0x8] sm:$0xff]  ;;  %v343_v14 = vmov 0.0   ;;  %vm143_vm1 = vcmask 523264  }
   0x5   :  { %286 = vmatpush3.msra.mxu0 %v32_v1  ;;  %v142_v6 = vld [vmem:[%s439_s3 + $0x38] sm:$0xff]  ;;  %v141_v7 = vld [vmem:[%s439_s3 + $0x30] sm:$0xff]  ;;  %v140_v8 = vld [vmem:[%s439_s3 + $0x28] sm:$0xff]  ;;  %27 = vst.msk [vmem:[#allocation2 + $0x8] sm:$0xff] %vm25_vm0, %v343_v14  ;;  %s344_s21 = smov [#allocation3]  }
   0x6   :  { %287 = vmatprep.subr.mxu0 %v31_v3  ;;  %294 = vmatprep.subr.mxu1 %v142_v6  ;;  %v139_v9 = vld [vmem:[%s439_s3 + $0x20] sm:$0xff]  ;;  %v138_v10 = vld [vmem:[%s439_s3 + $0x18] sm:$0xff]  ;;  %v137_v11 = vld [vmem:[%s439_s3 + $0x10] sm:$0xff]  ;;  %26 = vst.msk [vmem:[#allocation2] sm:$0xff] %vm25_vm0, %v343_v14  ;;  %s250_s22 = sshll.u32 %s344_s21, 4  ;;  %s251_s22 = int_to_ptr.vmem [resolvable:$true] %s250_s22 }
   0x7   :  { %288 = vmatpush3.msra.mxu0 %v31_v3  ;;  %295 = vmatpush3.msra.mxu1 %v142_v6  ;;  %v136_v12 = vld [vmem:[%s439_s3 + $0x8] sm:$0xff]  ;;  %v135_v13 = vld [vmem:[%s439_s3] sm:$0xff]  ;;  %s321_s23 = scalar_lea.vmem %s251_s22, 256  ;;  %p326_p1 = scmp.lt.s32.totalorder %s251_s22, %s251_s22 }
   0x8   :  { %289 = vmatprep.subr.mxu0 %v30_v4  ;;  %296 = vmatprep.subr.mxu1 %v141_v7  ;;  %v261_v15 = vld [vmem:[%s438_s2] ss:$0 sm:$0xff]  ;;  %p322_p0 = scmp.ne.s32.totalorder %s251_s22, %s321_s23  ;;  %p327_p2 = scmp.lt.s32.totalorder %s321_s23, %s321_s23 }
   0x9   :  { %290 = vmatpush3.msra.mxu0 %v30_v4  ;;  %297 = vmatpush3.msra.mxu1 %v141_v7  ;;  %v266_v36 = vld [vmem:[%s440_s4] ss:$0 sm:$0xff] }
   0xa   :  { %292 = vmatmul.mubr.msk.f32.vlgmr.msra.gmra.mxu0 %vm25_vm0, %v29_v5  ;;  %298 = vmatprep.subr.mxu1 %v140_v8  ;;  %p328_p3 = por %p327_p2, %p326_p1 }
   0xb   :  { %299 = vmatpush3.msra.mxu1 %v140_v8 }
   0xc   :  { %300 = vmatprep.subr.mxu1 %v139_v9  ;;  %v134_v30 = vld [vmem:[#allocation2 + $0x8] sm:$0xff]  ;;  %p329_p4 = pnand %p328_p3, %p322_p0 }
   0xd   :  { %301 = vmatpush3.msra.mxu1 %v139_v9  ;;  %v133_v32 = vld [vmem:[#allocation2] sm:$0xff] }
   0xe   :  { %302 = vmatprep.subr.mxu1 %v138_v10 }
   0xf   :  { %303 = vmatpush3.msra.mxu1 %v138_v10 }
  0x10   :  { %304 = vmatprep.subr.mxu1 %v137_v11 }
  0x11   :  { %305 = vmatpush3.msra.mxu1 %v137_v11 }
  0x12   :  { %306 = vmatprep.subr.mxu1 %v136_v12 }
  0x13   :  { %307 = vmatpush3.msra.mxu1 %v136_v12 }
  0x14   :  { %308 = vmatprep.subr.mxu1 %v135_v13 }
  0x15   :  { %309 = vmatpush3.msra.mxu1 %v135_v13 }
  0xca   :  { %v293_v16 = vpop.f32.mrf.mxu0 }
  0xcb   :  { %v120_v17 = vadd.f32 %v293_v16, %v261_v15 }
  0xcc   :  { %v114_v18 = vpop.f32.mrf.mxu0 }
  0xcd   :  { %v126_v19 = vmul.f32 0.70710677, %v120_v17  ;;  %v115_v20 = vadd.f32 %v261_v15, %v114_v18  ;;  %v124_v27 = vmul.f32 0.5, %v120_v17 }
  0xcf   :  { %317 = verf.f32 %v126_v19  ;;  %v125_v21 = vmul.f32 0.70710677, %v115_v20  ;;  %v123_v25 = vmul.f32 0.5, %v115_v20 }
  0xd1   :  { %319 = verf.f32 %v125_v21 }
  0xdc   :  { %v318_v22 = vpop.eup %317 }
  0xdd   :  { %v130_v24 = vadd.f32 1.0, %v318_v22 }
  0xde   :  { %v320_v23 = vpop.eup %319 }
  0xdf   :  { %v129_v26 = vadd.f32 1.0, %v320_v23  ;;  %v132_v29 = vmul.f32 %v130_v24, %v124_v27 }
  0xe1   :  { %v131_v28 = vmul.f32 %v129_v26, %v123_v25 }
  0xe3   :  { %310 = vmatprep.mubr.msk.f32.mxu1 %vm143_vm1, %v131_v28 }
  0xe4   :  { %311 = vmatmul.mubr.msk.f32.vlgmr.msra.gmra.mxu1 %vm143_vm1, %v132_v29 }
 0x1a4   :  { %v312_v31 = vpop.f32.mrf.mxu1 }
 0x1a5   :  { %v226_v33 = vadd.f32 %v312_v31, %v134_v30 }
 0x1a6   :  { %v216_v34 = vpop.f32.mrf.mxu1 }
 0x1a7   :  { %228 = vst.msk [vmem:[#allocation2 + $0x8] sm:$0xff] %vm25_vm0, %v226_v33  ;;  %v225_v35 = vadd.f32 %v216_v34, %v133_v32 }
 0x1a9   :  { %227 = vst.msk [vmem:[#allocation2] sm:$0xff] %vm25_vm0, %v225_v35 }
 0x1ae   :  { %v233_v37 = vld [vmem:[#allocation2 + $0x8] sm:$0xff] }
 0x1af   :  { %v242_v38 = vadd.f32 %v266_v36, %v233_v37 }
 0x1b0   :  { %v232_v39 = vld [vmem:[#allocation2] sm:$0xff] }
 0x1b1   :  { %v241_v40 = vadd.f32 %v266_v36, %v232_v39  ;;  %244 = vst.msk [vmem:[#allocation3 + $0x8] sm:$0xff] %vm25_vm0, %v242_v38 }
 0x1b3   :  { %243 = vst.msk [vmem:[#allocation3] sm:$0xff] %vm25_vm0, %v241_v40 }
 0x1b4   :  { %332 = shalt.err (!%p329_p4)
}
 0x1b5   :  { %s345_s24 = smov 128   ;;  %s346_s4 = smov 8  }
 0x1b6   :  { %256 = dma.vmem_to_hbm [thread:$0]  %s251_s22, 256, %s441_s5, [#allocation4], %s345_s24, %s345_s24, %s346_s4  }
 0x1b7   :  { %341 = dma.done.wait [#allocation4], 256  }
 0x1b8   :  { %342 = vsyncadd [#allocation4], 4294967040 }
 0x1b9   :  { %260 = vsyncpa [#allocation4], 1 }

</bundles_post_ra>
